<compile_context>
chip_gen: v6e
topology: v6e:2x2x1
jax: 0.10.0
libtpu: 0.0.40
codegen_flags: <defaults>
</compile_context>

<pallas_src>
import functools

import jax
import jax.numpy as jnp
from jax.experimental import pallas as pl
from jax.experimental.pallas import tpu as pltpu

EPS = 1e-5
EXPANSION = 4

_MAX_ROW_TILE = 512
_VMEM_LIMIT = 32 * 1024 * 1024      # scoped-VMEM request: within v5e/v6e/v7x limits
_VMEM_BUDGET = 24 * 1024 * 1024     # target working set (headroom under the limit)


# --------------------------------------------------------------------------
# Small helpers
# --------------------------------------------------------------------------
def _cparams(n_axes=1):
    return pltpu.CompilerParams(
        dimension_semantics=("parallel",) * n_axes,
        vmem_limit_bytes=_VMEM_LIMIT)


def _inv(shape):
    """Grid-invariant (weight / scale / bias) block: full array, fixed index."""
    return pl.BlockSpec(shape, lambda i, _n=len(shape): (0,) * _n)


def _pick_row_tile(M, row_bytes, resident_bytes):
    """Largest row tile (<=512) whose double-buffered blocks + resident weights
    fit the VMEM budget (review: v5e 16 MiB default / v7x 32 MiB default)."""
    tm = min(_MAX_ROW_TILE, M)
    while tm > 64 and 2 * tm * row_bytes + resident_bytes > _VMEM_BUDGET:
        tm //= 2
    if tm != M:
        tm = max(8, (tm // 8) * 8)
    return tm


# --------------------------------------------------------------------------
# Pallas kernels
# --------------------------------------------------------------------------
def _mm_bn_kernel(x_ref, w_ref, s_ref, b_ref, o_ref, *, relu):
    """(tm, K)bf16 @ (K, C)bf16 -> f32 acc -> scale/bias (+ReLU) -> store."""
    y = jnp.dot(x_ref[...], w_ref[...], preferred_element_type=jnp.float32)
    y = y * s_ref[...] + b_ref[...]
    if relu:
        y = jnp.maximum(y, 0.0)
    o_ref[...] = y.astype(o_ref.dtype)


def _conv2_s1_kernel(y_ref, w_ref, s_ref, b_ref, o_ref, zpad_ref, *, H, W):
    """Fused 3x3 stride-1 conv + bn2 + relu for one image.

      y_ref   : (1, H, W, Cin)   bf16   unpadded conv1 output image
      w_ref   : (3, 3*Cin, Cout) bf16   ky-major, kx taps concatenated along K
      o_ref   : (1, H, W, Cout)  bf16
      zpad_ref: ((H+3)*(W+2), Cin) bf16 VMEM scratch (zero-padded, row-flat)

    Every tap is a contiguous slice of the flat padded buffer, so there is no
    HBM pad pass, no per-tap reshape, and only 3 deep (K=3*Cin) matmuls.
    """
    Wp = W + 2
    M = H * Wp
    cout = w_ref.shape[-1]

    # Zero the padded flat buffer, then copy the image rows into its interior.
    zpad_ref[...] = jnp.zeros_like(zpad_ref)
    for h in range(H):
        zpad_ref[pl.ds((h + 1) * Wp + 1, W), :] = y_ref[0, h]
    z = zpad_ref[...]

    acc = jnp.zeros((M, cout), jnp.float32)
    for ky in range(3):
        base = ky * Wp
        strip = jnp.concatenate(
            [z[base:base + M], z[base + 1:base + 1 + M], z[base + 2:base + 2 + M]],
            axis=-1)                                    # (M, 3*Cin)
        acc = acc + jnp.dot(strip, w_ref[ky],
                            preferred_element_type=jnp.float32)

    y = jnp.maximum(acc * s_ref[...] + b_ref[...], 0.0).astype(o_ref.dtype)
    # Row m = oy*Wp + ox; columns ox >= W are padding garbage -> dropped here.
    for h in range(H):
        o_ref[0, h] = y[h * Wp:h * Wp + W, :]


def _conv2_s2_kernel(*refs, n_phase, taps, Ho, Wo):
    """Fused 3x3 strided conv + bn2 + relu for one image (phase-split inputs).

    refs = (phase_0..phase_{n_phase-1}, w2, scale2, bias2, out)
      phase_p : (1, ph, pw, Cin)  bf16  -- stride-phase view of padded y1
      w2      : (9, Cin, Cout)    bf16  -- tap-major (ky*3 + kx)
      out     : (1, Ho*Wo, Cout)  bf16
    taps[t] = (phase_idx, row_off, col_off); every tap slice is contiguous.
    """
    phase_refs = refs[:n_phase]
    w2_ref, s_ref, b_ref, o_ref = refs[n_phase:n_phase + 4]
    cout = w2_ref.shape[2]

    phase_vals = [p_ref[0] for p_ref in phase_refs]
    acc = jnp.zeros((Ho * Wo, cout), jnp.float32)
    for t, (pi, oy, ox) in enumerate(taps):
        tap = phase_vals[pi][oy:oy + Ho, ox:ox + Wo, :]          # (Ho, Wo, Cin)
        tap2d = tap.reshape(Ho * Wo, tap.shape[-1])
        acc = acc + jnp.dot(tap2d, w2_ref[t],
                            preferred_element_type=jnp.float32)
    y = jnp.maximum(acc * s_ref[...] + b_ref[...], 0.0)
    o_ref[0] = y.astype(o_ref.dtype)


def _head_proj_kernel(y_ref, w3_ref, s3_ref, b3_ref,
                      xs_ref, ws_ref, ss_ref, bs_ref, *out_refs, with_pre):
    """conv3(1x1)+bn3 + projection shortcut (1x1 conv + bn) + add + relu."""
    main = jnp.dot(y_ref[...], w3_ref[...], preferred_element_type=jnp.float32)
    main = main * s3_ref[...] + b3_ref[...]
    sc = jnp.dot(xs_ref[...], ws_ref[...], preferred_element_type=jnp.float32)
    sc = sc * ss_ref[...] + bs_ref[...]
    pre = main + sc
    out_refs[0][...] = jnp.maximum(pre, 0.0).astype(out_refs[0].dtype)
    if with_pre:
        out_refs[1][...] = pre.astype(out_refs[1].dtype)


def _head_id_kernel(y_ref, w3_ref, s3_ref, b3_ref, xs_ref, *out_refs, with_pre):
    """conv3(1x1)+bn3 + identity shortcut + add + relu."""
    main = jnp.dot(y_ref[...], w3_ref[...], preferred_element_type=jnp.float32)
    main = main * s3_ref[...] + b3_ref[...]
    pre = main + xs_ref[...].astype(jnp.float32)
    out_refs[0][...] = jnp.maximum(pre, 0.0).astype(out_refs[0].dtype)
    if with_pre:
        out_refs[1][...] = pre.astype(out_refs[1].dtype)


# --------------------------------------------------------------------------
# pallas_call wrappers
# --------------------------------------------------------------------------
def _matmul_bn_act(x2d, w, scale, bias, *, relu, out_dtype):
    M, K = x2d.shape
    C = w.shape[1]
    tm = _pick_row_tile(M, (K + C) * 2, 2 * (K * C * 2 + 4 * C * 4))
    return pl.pallas_call(
        functools.partial(_mm_bn_kernel, relu=relu),
        out_shape=jax.ShapeDtypeStruct((M, C), out_dtype),
        grid_spec=pltpu.PrefetchScalarGridSpec(
            num_scalar_prefetch=0,
            grid=(pl.cdiv(M, tm),),
            in_specs=[pl.BlockSpec((tm, K), lambda i: (i, 0)),
                      _inv((K, C)), _inv((1, C)), _inv((1, C))],
            out_specs=pl.BlockSpec((tm, C), lambda i: (i, 0)),
        ),
        compiler_params=_cparams(1),
    )(x2d, w, scale, bias)


def _conv2_s1(y1, w2g, s2, b2):
    N, H, W, C = y1.shape
    cout = w2g.shape[-1]
    Wp = W + 2
    return pl.pallas_call(
        functools.partial(_conv2_s1_kernel, H=H, W=W),
        out_shape=jax.ShapeDtypeStruct((N, H, W, cout), jnp.bfloat16),
        grid_spec=pltpu.PrefetchScalarGridSpec(
            num_scalar_prefetch=0,
            grid=(N,),
            in_specs=[pl.BlockSpec((1, H, W, C), lambda n: (n, 0, 0, 0)),
                      _inv((3, 3 * C, cout)), _inv((1, cout)), _inv((1, cout))],
            out_specs=pl.BlockSpec((1, H, W, cout), lambda n: (n, 0, 0, 0)),
            scratch_shapes=[pltpu.VMEM(((H + 3) * Wp, C), jnp.bfloat16)],
        ),
        compiler_params=_cparams(1),
    )(y1, w2g, s2, b2)


def _conv2_s2(phases, taps, w2, s2, b2, Ho, Wo):
    N = phases[0].shape[0]
    cout = w2.shape[2]
    n_phase = len(phases)
    in_specs = [pl.BlockSpec((1,) + tuple(ph.shape[1:]),
                             lambda n: (n, 0, 0, 0)) for ph in phases]
    in_specs += [_inv(tuple(w2.shape)), _inv((1, cout)), _inv((1, cout))]
    return pl.pallas_call(
        functools.partial(_conv2_s2_kernel, n_phase=n_phase, taps=tuple(taps),
                          Ho=Ho, Wo=Wo),
        out_shape=jax.ShapeDtypeStruct((N, Ho * Wo, cout), jnp.bfloat16),
        grid_spec=pltpu.PrefetchScalarGridSpec(
            num_scalar_prefetch=0,
            grid=(N,),
            in_specs=in_specs,
            out_specs=pl.BlockSpec((1, Ho * Wo, cout), lambda n: (n, 0, 0)),
        ),
        compiler_params=_cparams(1),
    )(*phases, w2, s2, b2)


def _head_proj(y2, w3, s3, b3, xs, ws, ss, bs, *, with_pre):
    M, K = y2.shape
    C4 = w3.shape[1]
    Ks = ws.shape[0]
    row_bytes = (K + Ks + C4) * 2 + (C4 * 4 if with_pre else 0)
    resident = 2 * ((K + Ks) * C4 * 2 + 4 * C4 * 4)
    tm = _pick_row_tile(M, row_bytes, resident)
    row_spec = lambda width: pl.BlockSpec((tm, width), lambda i: (i, 0))
    o_bf = jax.ShapeDtypeStruct((M, C4), jnp.bfloat16)
    o_f32 = jax.ShapeDtypeStruct((M, C4), jnp.float32)
    out_shape = (o_bf, o_f32) if with_pre else o_bf
    out_specs = (row_spec(C4), row_spec(C4)) if with_pre else row_spec(C4)
    return pl.pallas_call(
        functools.partial(_head_proj_kernel, with_pre=with_pre),
        out_shape=out_shape,
        grid_spec=pltpu.PrefetchScalarGridSpec(
            num_scalar_prefetch=0,
            grid=(pl.cdiv(M, tm),),
            in_specs=[row_spec(K), _inv((K, C4)), _inv((1, C4)), _inv((1, C4)),
                      row_spec(Ks), _inv((Ks, C4)), _inv((1, C4)), _inv((1, C4))],
            out_specs=out_specs,
        ),
        compiler_params=_cparams(1),
    )(y2, w3, s3, b3, xs, ws, ss, bs)


def _head_identity(y2, w3, s3, b3, xs, *, with_pre):
    M, K = y2.shape
    C4 = w3.shape[1]
    row_bytes = (K + 2 * C4) * 2 + (C4 * 4 if with_pre else 0)
    resident = 2 * (K * C4 * 2 + 2 * C4 * 4)
    tm = _pick_row_tile(M, row_bytes, resident)
    row_spec = lambda width: pl.BlockSpec((tm, width), lambda i: (i, 0))
    o_bf = jax.ShapeDtypeStruct((M, C4), jnp.bfloat16)
    o_f32 = jax.ShapeDtypeStruct((M, C4), jnp.float32)
    out_shape = (o_bf, o_f32) if with_pre else o_bf
    out_specs = (row_spec(C4), row_spec(C4)) if with_pre else row_spec(C4)
    return pl.pallas_call(
        functools.partial(_head_id_kernel, with_pre=with_pre),
        out_shape=out_shape,
        grid_spec=pltpu.PrefetchScalarGridSpec(
            num_scalar_prefetch=0,
            grid=(pl.cdiv(M, tm),),
            in_specs=[row_spec(K), _inv((K, C4)), _inv((1, C4)), _inv((1, C4)),
                      row_spec(C4)],
            out_specs=out_specs,
        ),
        compiler_params=_cparams(1),
    )(y2, w3, s3, b3, xs)


# --------------------------------------------------------------------------
# BN folding, parameter preparation and the stride-phase split (stride>1 only)
# --------------------------------------------------------------------------
def _fold_bn(bn_params):
    g, b, m, v = (t.astype(jnp.float32) for t in bn_params)
    s = g / jnp.sqrt(v + EPS)
    return s.reshape(1, -1), (b - m * s).reshape(1, -1)


def prepare_block_params(params, stride):
    """Hoist weight transposes, bf16 casts and BN folding out of the forward.
    Call once per block; reuse the result every step (review item)."""
    prep = {}
    prep['w1'] = jnp.transpose(params['w1'][:, :, 0, 0], (1, 0)).astype(jnp.bfloat16)
    prep['s1'], prep['b1'] = _fold_bn(params['bn1'])

    w2 = jnp.transpose(params['w2'], (2, 3, 1, 0))           # (3, 3, Cin, Cout)
    cin2, cout2 = w2.shape[2], w2.shape[3]
    if stride == 1:
        prep['w2'] = w2.reshape(3, 3 * cin2, cout2).astype(jnp.bfloat16)
    else:
        prep['w2'] = w2.reshape(9, cin2, cout2).astype(jnp.bfloat16)
    prep['s2'], prep['b2'] = _fold_bn(params['bn2'])

    prep['w3'] = jnp.transpose(params['w3'][:, :, 0, 0], (1, 0)).astype(jnp.bfloat16)
    prep['s3'], prep['b3'] = _fold_bn(params['bn3'])

    if 'ws' in params:
        prep['ws'] = jnp.transpose(params['ws'][:, :, 0, 0], (1, 0)).astype(jnp.bfloat16)
        prep['ss'], prep['bs'] = _fold_bn(params['bns'])
    return prep


def _phase_split(y1pad, stride):
    """Split the padded conv1 output into stride phases so every 3x3 tap is a
    contiguous static slice inside the stride>1 conv2 kernel."""
    s = stride
    N, Hp, Wp, C = y1pad.shape
    Ho = (Hp - 3) // s + 1
    Wo = (Wp - 3) // s + 1
    residues = sorted({k % s for k in range(3)})

    def extent(res, out_len):
        return out_len + max(k // s for k in range(3) if k % s == res)

    phases, index = [], {}
    for a in residues:
        nh = extent(a, Ho)
        for b in residues:
            nw = extent(b, Wo)
            ph = jax.lax.slice(y1pad, (0, a, b, 0),
                               (N, a + s * (nh - 1) + 1, b + s * (nw - 1) + 1, C),
                               (1, s, s, 1))
            index[(a, b)] = len(phases)
            phases.append(ph)
    taps = [(index[(ky % s, kx % s)], ky // s, kx // s)
            for ky in range(3) for kx in range(3)]
    return phases, taps, Ho, Wo


# --------------------------------------------------------------------------
# Bottleneck forward (Pallas-backed)
# --------------------------------------------------------------------------
def bottleneck_forward_nhwc(x, prep, stride=1, is_last=False):
    """NHWC bf16 in, NHWC out (out: bf16, preact: f32).  Use this entry point
    (with params prepared once) when chaining blocks."""
    N, H, W, Cin = x.shape
    P = prep['w1'].shape[1]
    C4 = prep['w3'].shape[1]

    # conv1 (1x1) + bn1 + relu
    y1 = _matmul_bn_act(x.reshape(N * H * W, Cin), prep['w1'], prep['s1'],
                        prep['b1'], relu=True, out_dtype=jnp.bfloat16)
    y1 = y1.reshape(N, H, W, P)

    # conv2 (3x3, stride, pad=1) + bn2 + relu
    if stride == 1:
        Ho, Wo = H, W
        y2 = _conv2_s1(y1, prep['w2'], prep['s2'], prep['b2'])      # (N,H,W,P)
    else:
        y1pad = jnp.pad(y1, ((0, 0), (1, 1), (1, 1), (0, 0)))
        phases, taps, Ho, Wo = _phase_split(y1pad, stride)
        y2 = _conv2_s2(phases, taps, prep['w2'], prep['s2'], prep['b2'], Ho, Wo)
        y2 = y2.reshape(N, Ho, Wo, P)
    y2_2d = y2.reshape(N * Ho * Wo, P)

    # conv3 (1x1) + bn3, shortcut, add, relu — fused head kernel
    if 'ws' in prep:
        xs = x if stride == 1 else x[:, ::stride, ::stride, :]
        xs = xs.reshape(N * Ho * Wo, Cin)
        res = _head_proj(y2_2d, prep['w3'], prep['s3'], prep['b3'],
                         xs, prep['ws'], prep['ss'], prep['bs'], with_pre=is_last)
    else:
        if stride != 1 or Cin != C4:
            raise ValueError("identity shortcut requires stride == 1 and "
                             "in_planes == expansion * planes")
        xs = x.reshape(N * H * W, Cin)
        res = _head_identity(y2_2d, prep['w3'], prep['s3'], prep['b3'], xs,
                             with_pre=is_last)

    if is_last:
        out2d, pre2d = res
        return out2d.reshape(N, Ho, Wo, C4), pre2d.reshape(N, Ho, Wo, C4)
    return res.reshape(N, Ho, Wo, C4)


def bottleneck_forward(x_nchw, params, stride=1, is_last=False):
    """PyTorch-compatible NCHW f32 API.  For multi-block networks hoist
    `prepare_block_params` and keep activations NHWC bf16 between blocks."""
    prep = prepare_block_params(params, stride)
    x = jnp.transpose(x_nchw, (0, 2, 3, 1)).astype(jnp.bfloat16)
    res = bottleneck_forward_nhwc(x, prep, stride=stride, is_last=is_last)

    def to_nchw(t):
        return jnp.transpose(t.astype(jnp.float32), (0, 3, 1, 2))

    if is_last:
        return to_nchw(res[0]), to_nchw(res[1])
    return to_nchw(res)


# --------------------------------------------------------------------------
# Plain-JAX reference (NCHW, lax.conv) for correctness checking.  It mirrors
# the kernel's bf16 quantisation points (bf16 matmul operands and bf16
# intermediates, f32 accumulation / BN / ReLU).
# --------------------------------------------------------------------------
def _ref_bottleneck(x, params, stride):
    q = lambda t: t.astype(jnp.bfloat16).astype(jnp.float32)

    def conv(a, w, s=1, p=0):
        return jax.lax.conv_general_dilated(
            q(a), q(w), window_strides=(s, s), padding=((p, p), (p, p)),
            dimension_numbers=('NCHW', 'OIHW', 'NCHW'),
            precision=jax.lax.Precision.HIGHEST)

    def bn(y, prm):
        g, b, m, v = (t.reshape(1, -1, 1, 1) for t in prm)
        return (y - m) / jnp.sqrt(v + EPS) * g + b

    y1 = q(jax.nn.relu(bn(conv(x, params['w1']), params['bn1'])))
    y2 = q(jax.nn.relu(bn(conv(y1, params['w2'], s=stride, p=1), params['bn2'])))
    main = bn(conv(y2, params['w3']), params['bn3'])
    if 'ws' in params:
        sc = bn(conv(x, params['ws'], s=stride), params['bns'])
    else:
        sc = q(x)
    pre = main + sc
    return jax.nn.relu(pre), pre


# --------------------------------------------------------------------------
# Deterministic parameter init (matches the PyTorch module's shapes)
# --------------------------------------------------------------------------
def init_params(key, in_planes, planes, stride):
    ks = jax.random.split(key, 8)

    def w(k, shape):
        return 0.1 * jax.random.normal(k, shape, jnp.float32)

    def bn(k, c):
        k1, k2, k3, k4 = jax.random.split(k, 4)
        return (1.0 + 0.1 * jax.random.normal(k1, (c,), jnp.float32),   # gamma
                0.1 * jax.random.normal(k2, (c,), jnp.float32),         # beta
                0.1 * jax.random.normal(k3, (c,), jnp.float32),         # running_mean
                1.0 + 0.1 * jnp.abs(jax.random.normal(k4, (c,), jnp.float32)))  # running_var

    p = {
        'w1': w(ks[0], (planes, in_planes, 1, 1)),
        'bn1': bn(ks[1], planes),
        'w2': w(ks[2], (planes, planes, 3, 3)),
        'bn2': bn(ks[3], planes),
        'w3': w(ks[4], (EXPANSION * planes, planes, 1, 1)),
        'bn3': bn(ks[5], EXPANSION * planes),
    }
    if stride != 1 or in_planes != EXPANSION * planes:
        p['ws'] = w(ks[6], (EXPANSION * planes, in_planes, 1, 1))
        p['bns'] = bn(ks[7], EXPANSION * planes)
    return p


if __name__ == "__main__":
    key = jax.random.PRNGKey(0)
    kx1, kp1, kx2, kp2 = jax.random.split(key, 4)

    # Case 1: projection shortcut (stride=2), is_last=True  -> legacy conv2 path
    in_planes, planes, stride = 4, 4, 2
    x1 = jax.random.normal(kx1, (2, in_planes, 16, 16), jnp.float32)
    p1 = init_params(kp1, in_planes, planes, stride)
    out1, pre1 = bottleneck_forward(x1, p1, stride=stride, is_last=True)
    out1 = jax.block_until_ready(out1)
    pre1 = jax.block_until_ready(pre1)
    r_out1, r_pre1 = _ref_bottleneck(x1, p1, stride)
    # bf16 matmul operands / intermediates -> compare at bf16-level tolerance.
    assert jnp.allclose(out1, r_out1, rtol=1e-2, atol=1e-2)
    assert jnp.allclose(pre1, r_pre1, rtol=1e-2, atol=1e-2)

    # Case 2: identity shortcut (stride=1), is_last=False  -> fused conv2 path
    in_planes2, planes2, stride2 = 16, 4, 1
    x2 = jax.random.normal(kx2, (2, in_planes2, 16, 16), jnp.float32)
    p2 = init_params(kp2, in_planes2, planes2, stride2)
    out2 = bottleneck_forward(x2, p2, stride=stride2, is_last=False)
    out2 = jax.block_until_ready(out2)
    r_out2, _ = _ref_bottleneck(x2, p2, stride2)
    assert jnp.allclose(out2, r_out2, rtol=1e-2, atol=1e-2)

    print("KERNEL_OK")
</pallas_src>

<mosaic_0001>
module attributes {stable_mosaic.version = 11 : i64} {
  func.func @_mm_bn_kernel(%arg0: i32, %arg1: memref<512x4xbf16, #tpu.memory_space<vmem>>, %arg2: memref<4x4xbf16, #tpu.memory_space<vmem>>, %arg3: memref<1x4xf32, #tpu.memory_space<vmem>>, %arg4: memref<1x4xf32, #tpu.memory_space<vmem>>, %arg5: memref<512x4xbf16, #tpu.memory_space<vmem>>) attributes {dimension_semantics = [#tpu.dimension_semantics<parallel>], iteration_bounds = array<i64: 1>, scalar_prefetch = 0 : i64, scratch_operands = 0 : i64, tpu.core_type = #tpu.core_type<tc>, window_params = [{transform_indices = @transform_0, window_bounds = array<i64: 512, 4>}, {pipeline_mode = #tpu.pipeline_mode<synchronous>, transform_indices = @transform_1, window_bounds = array<i64: 4, 4>}, {pipeline_mode = #tpu.pipeline_mode<synchronous>, transform_indices = @transform_2, window_bounds = array<i64: 1, 4>}, {pipeline_mode = #tpu.pipeline_mode<synchronous>, transform_indices = @transform_3, window_bounds = array<i64: 1, 4>}, {transform_indices = @transform_4, window_bounds = array<i64: 512, 4>}]} {
    %c0 = arith.constant 0 : index
    %c0_0 = arith.constant 0 : index
    %0 = vector.load %arg1[%c0, %c0_0] : memref<512x4xbf16, #tpu.memory_space<vmem>>, vector<512x4xbf16>
    %c0_1 = arith.constant 0 : index
    %c0_2 = arith.constant 0 : index
    %1 = vector.load %arg2[%c0_1, %c0_2] : memref<4x4xbf16, #tpu.memory_space<vmem>>, vector<4x4xbf16>
    %cst = arith.constant dense<0.000000e+00> : vector<512x4xf32>
    %2 = tpu.matmul %0, %1, %cst {dimension_numbers = #tpu.dot_dimension_numbers<[1], [0], [0], [1], [0, 0, 1, 1], [], []>} : vector<512x4xbf16>, vector<4x4xbf16>, vector<512x4xf32> -> vector<512x4xf32>
    %c0_3 = arith.constant 0 : index
    %c0_4 = arith.constant 0 : index
    %3 = vector.load %arg3[%c0_3, %c0_4] : memref<1x4xf32, #tpu.memory_space<vmem>>, vector<1x4xf32>
    %4 = vector.broadcast %3 : vector<1x4xf32> to vector<512x4xf32>
    %5 = arith.mulf %2, %4 : vector<512x4xf32>
    %c0_5 = arith.constant 0 : index
    %c0_6 = arith.constant 0 : index
    %6 = vector.load %arg4[%c0_5, %c0_6] : memref<1x4xf32, #tpu.memory_space<vmem>>, vector<1x4xf32>
    %7 = vector.broadcast %6 : vector<1x4xf32> to vector<512x4xf32>
    %8 = arith.addf %5, %7 : vector<512x4xf32>
    %cst_7 = arith.constant 0.000000e+00 : f32
    %9 = vector.broadcast %cst_7 : f32 to vector<512x4xf32>
    %10 = arith.maximumf %8, %9 : vector<512x4xf32>
    %11 = arith.truncf %10 : vector<512x4xf32> to vector<512x4xbf16>
    %c0_8 = arith.constant 0 : index
    %c0_9 = arith.constant 0 : index
    %12 = vector.load %arg5[%c0_8, %c0_9] : memref<512x4xbf16, #tpu.memory_space<vmem>>, vector<512x4xbf16>
    tpu.vector_store %arg5[%c0_8, %c0_9], %11 {strides = array<i32>} : memref<512x4xbf16, #tpu.memory_space<vmem>>, vector<512x4xbf16>,
    return
  }
  func.func @transform_0(%arg0: i32) -> (i32, i32) {
    %c0_i32 = arith.constant 0 : i32
    %c0_i32_0 = arith.constant 0 : i32
    return %arg0, %c0_i32 : i32, i32
  }
  func.func @transform_1(%arg0: i32) -> (i32, i32) {
    %c0_i32 = arith.constant 0 : i32
    %c0_i32_0 = arith.constant 0 : i32
    %c0_i32_1 = arith.constant 0 : i32
    return %c0_i32, %c0_i32_0 : i32, i32
  }
  func.func @transform_2(%arg0: i32) -> (i32, i32) {
    %c0_i32 = arith.constant 0 : i32
    %c0_i32_0 = arith.constant 0 : i32
    %c0_i32_1 = arith.constant 0 : i32
    return %c0_i32, %c0_i32_0 : i32, i32
  }
  func.func @transform_3(%arg0: i32) -> (i32, i32) {
    %c0_i32 = arith.constant 0 : i32
    %c0_i32_0 = arith.constant 0 : i32
    %c0_i32_1 = arith.constant 0 : i32
    return %c0_i32, %c0_i32_0 : i32, i32
  }
  func.func @transform_4(%arg0: i32) -> (i32, i32) {
    %c0_i32 = arith.constant 0 : i32
    %c0_i32_0 = arith.constant 0 : i32
    return %arg0, %c0_i32 : i32, i32
  }
}

</mosaic_0001>

<bundles_post_ra>
// kernel: tpu_custom_call.1
= control target key start
LH: loop header
LB: loop body
LE: loop exit
PB: predicated region body
PF: predicated region fallthrough
CT: control target
= control target key end

     0   :  { %vm340_vm0 = vcmask 1041408   ;;  %vm243_vm1 = vcmask 31744   ;;  %vm1095_vm2 = vcmask 27648   ;;  %s2043_s1 = inlined_call_operand.vmem [shape: bf16[4,4], index: 1, kind: input, shape index: {}]   ;;  %s2044_s0 = inlined_call_operand.vmem [shape: bf16[512,4], index: 0, kind: input, shape index: {}]   ;;  %s2045_s2 = inlined_call_operand.vmem [shape: f32[1,4], index: 2, kind: input, shape index: {}]   ;;  %s2046_s3 = inlined_call_operand.vmem [shape: f32[1,4], index: 3, kind: input, shape index: {}]   ;;  %s2047_s4 = inlined_call_operand.vmem [shape: bf16[512,4], index: 4, kind: output, shape index: {}]  }
   0x1   :  { %v82_v0 = vld [vmem:[%s2043_s1] sm:$0x3]  ;;  %v1463_v4 = vld [vmem:[%s2044_s0 + $0x8] sm:$0xff]   ;;  %v1465_v6 = vld [vmem:[%s2044_s0 + $0x10] sm:$0xff]  }
   0x2   :  { %1459 = vmatprep.subr.msk.bf16.mxu0 %vm340_vm0, %v82_v0  ;;  %1460 = vmatprep.subr.msk.bf16.mxu1 %vm340_vm0, %v82_v0  ;;  %v342_v1 = vsel %vm340_vm0, %v82_v0, 0  ;;  %v1461_v2 = vld [vmem:[%s2044_s0] sm:$0xff]   ;;  %v1464_v5 = vld [vmem:[%s2044_s0 + $0x88] sm:$0xff]   ;;  %v1466_v7 = vld [vmem:[%s2044_s0 + $0x90] sm:$0xff]  }
   0x3   :  { %1392 = vmatpush3.bf16.msra.mxu0 %v342_v1  ;;  %1458 = vmatpush3.bf16.msra.mxu1 %v342_v1  ;;  %v1462_v3 = vld [vmem:[%s2044_s0 + $0x80] sm:$0xff]   ;;  %v1467_v8 = vld [vmem:[%s2044_s0 + $0x18] sm:$0xff]   ;;  %v1471_v12 = vld [vmem:[%s2044_s0 + $0x28] sm:$0xff]  }
   0x4   :  { %1393 = vmatprep.mubr.msk.bf16.mxu0 %vm243_vm1, %v1461_v2  ;;  %1425 = vmatprep.mubr.msk.bf16.mxu1 %vm243_vm1, %v1462_v3  ;;  %v1468_v9 = vld [vmem:[%s2044_s0 + $0x98] sm:$0xff]   ;;  %v1469_v10 = vld [vmem:[%s2044_s0 + $0x20] sm:$0xff]   ;;  %v1472_v13 = vld [vmem:[%s2044_s0 + $0xa8] sm:$0xff]  }
   0x5   :  { %v1470_v11 = vld [vmem:[%s2044_s0 + $0xa0] sm:$0xff]   ;;  %v1473_v14 = vld [vmem:[%s2044_s0 + $0x30] sm:$0xff]   ;;  %v1475_v16 = vld [vmem:[%s2044_s0 + $0x38] sm:$0xff]  }
   0x6   :  { %1394 = vmatmul.mubr.msk.bf16.vlgmr.msra.gmra.mxu0 %vm243_vm1, %v1463_v4  ;;  %1426 = vmatmul.mubr.msk.bf16.vlgmr.msra.gmra.mxu1 %vm243_vm1, %v1464_v5  ;;  %v1474_v15 = vld [vmem:[%s2044_s0 + $0xb0] sm:$0xff]   ;;  %v1476_v17 = vld [vmem:[%s2044_s0 + $0xb8] sm:$0xff]   ;;  %v1477_v18 = vld [vmem:[%s2044_s0 + $0x40] sm:$0xff]  }
   0x7   :  { %1397 = vmatprep.mubr.msk.bf16.mxu0 %vm243_vm1, %v1465_v6  ;;  %1429 = vmatprep.mubr.msk.bf16.mxu1 %vm243_vm1, %v1466_v7  ;;  %v1478_v19 = vld [vmem:[%s2044_s0 + $0xc0] sm:$0xff]   ;;  %v1479_v20 = vld [vmem:[%s2044_s0 + $0x48] sm:$0xff]   ;;  %v1481_v22 = vld [vmem:[%s2044_s0 + $0x50] sm:$0xff]  }
   0x8   :  { %v1480_v21 = vld [vmem:[%s2044_s0 + $0xc8] sm:$0xff]   ;;  %v1482_v23 = vld [vmem:[%s2044_s0 + $0xd0] sm:$0xff]   ;;  %v1483_v24 = vld [vmem:[%s2044_s0 + $0x58] sm:$0xff]  }
   0x9   :  { %v1484_v25 = vld [vmem:[%s2044_s0 + $0xd8] sm:$0xff]   ;;  %v1485_v26 = vld [vmem:[%s2044_s0 + $0x60] sm:$0xff]   ;;  %v1487_v28 = vld [vmem:[%s2044_s0 + $0x68] sm:$0xff]  }
   0xa   :  { %v1486_v27 = vld [vmem:[%s2044_s0 + $0xe0] sm:$0xff]   ;;  %v1488_v29 = vld [vmem:[%s2044_s0 + $0xe8] sm:$0xff]   ;;  %v1489_v30 = vld [vmem:[%s2044_s0 + $0x70] sm:$0xff]  }
   0xb   :  { %v1490_v31 = vld [vmem:[%s2044_s0 + $0xf0] sm:$0xff]   ;;  %v1491_v32 = vld [vmem:[%s2044_s0 + $0x78] sm:$0xff]   ;;  %v1652_v34 = vld [vmem:[%s2045_s2] ss:$0 sm:$0xff] }
   0xc   :  { %v1492_v33 = vld [vmem:[%s2044_s0 + $0xf8] sm:$0xff]   ;;  %v1657_v36 = vld [vmem:[%s2046_s3] ss:$0 sm:$0xff] }
   0xe   :  { %1398 = vmatmul.mubr.msk.bf16.gmra.mxu0 %vm243_vm1, %v1467_v8  ;;  %1430 = vmatmul.mubr.msk.bf16.gmra.mxu1 %vm243_vm1, %v1468_v9 }
   0xf   :  { %1401 = vmatprep.mubr.msk.bf16.mxu0 %vm243_vm1, %v1469_v10  ;;  %1433 = vmatprep.mubr.msk.bf16.mxu1 %vm243_vm1, %v1470_v11 }
  0x16   :  { %1402 = vmatmul.mubr.msk.bf16.gmra.mxu0 %vm243_vm1, %v1471_v12  ;;  %1434 = vmatmul.mubr.msk.bf16.gmra.mxu1 %vm243_vm1, %v1472_v13 }
  0x17   :  { %1405 = vmatprep.mubr.msk.bf16.mxu0 %vm243_vm1, %v1473_v14  ;;  %1437 = vmatprep.mubr.msk.bf16.mxu1 %vm243_vm1, %v1474_v15 }
  0x1e   :  { %1406 = vmatmul.mubr.msk.bf16.gmra.mxu0 %vm243_vm1, %v1475_v16  ;;  %1438 = vmatmul.mubr.msk.bf16.gmra.mxu1 %vm243_vm1, %v1476_v17 }
  0x1f   :  { %1409 = vmatprep.mubr.msk.bf16.mxu0 %vm243_vm1, %v1477_v18  ;;  %1441 = vmatprep.mubr.msk.bf16.mxu1 %vm243_vm1, %v1478_v19 }
  0x26   :  { %1410 = vmatmul.mubr.msk.bf16.gmra.mxu0 %vm243_vm1, %v1479_v20  ;;  %1442 = vmatmul.mubr.msk.bf16.gmra.mxu1 %vm243_vm1, %v1480_v21 }
  0x27   :  { %1413 = vmatprep.mubr.msk.bf16.mxu0 %vm243_vm1, %v1481_v22  ;;  %1445 = vmatprep.mubr.msk.bf16.mxu1 %vm243_vm1, %v1482_v23 }
  0x2e   :  { %1414 = vmatmul.mubr.msk.bf16.gmra.mxu0 %vm243_vm1, %v1483_v24  ;;  %1446 = vmatmul.mubr.msk.bf16.gmra.mxu1 %vm243_vm1, %v1484_v25 }
  0x2f   :  { %1417 = vmatprep.mubr.msk.bf16.mxu0 %vm243_vm1, %v1485_v26  ;;  %1449 = vmatprep.mubr.msk.bf16.mxu1 %vm243_vm1, %v1486_v27 }
  0x36   :  { %1418 = vmatmul.mubr.msk.bf16.gmra.mxu0 %vm243_vm1, %v1487_v28  ;;  %1450 = vmatmul.mubr.msk.bf16.gmra.mxu1 %vm243_vm1, %v1488_v29 }
  0x37   :  { %1421 = vmatprep.mubr.msk.bf16.mxu0 %vm243_vm1, %v1489_v30  ;;  %1453 = vmatprep.mubr.msk.bf16.mxu1 %vm243_vm1, %v1490_v31 }
  0x3e   :  { %1422 = vmatmul.mubr.msk.bf16.gmra.mxu0 %vm243_vm1, %v1491_v32  ;;  %1454 = vmatmul.mubr.msk.bf16.gmra.mxu1 %vm243_vm1, %v1492_v33 }
  0xc6   :  { %v1395_v35 = vpop.f32.mrf.mxu0  ;;  %v1427_v38 = vpop.f32.mrf.mxu1 }
  0xc7   :  { %v642_v37 = vmul.f32 %v1395_v35, %v1652_v34  ;;  %v674_v39 = vmul.f32 %v1427_v38, %v1652_v34 }
  0xc8   :  { %v378_v40 = vpop.f32.mrf.mxu0  ;;  %v506_v43 = vpop.f32.mrf.mxu1 }
  0xc9   :  { %v713_v41 = vadd.f32 %v1657_v36, %v642_v37  ;;  %v640_v42 = vmul.f32 %v1652_v34, %v378_v40  ;;  %v745_v44 = vadd.f32 %v1657_v36, %v674_v39  ;;  %v672_v45 = vmul.f32 %v1652_v34, %v506_v43 }
  0xca   :  { %v1396_v46 = vpop.f32.mrf.mxu0  ;;  %v1428_v50 = vpop.f32.mrf.mxu1 }
  0xcb   :  { %v777_v47 = vmax.f32 %v713_v41, 0.0  ;;  %v711_v48 = vadd.f32 %v1657_v36, %v640_v42  ;;  %v643_v49 = vmul.f32 %v1396_v46, %v1652_v34  ;;  %v809_v51 = vmax.f32 %v745_v44, 0.0 }
  0xcc   :  { %v743_v52 = vadd.f32 %v1657_v36, %v672_v45  ;;  %v675_v53 = vmul.f32 %v1428_v50, %v1652_v34  ;;  %v381_v54 = vpop.f32.mrf.mxu0  ;;  %v509_v59 = vpop.f32.mrf.mxu1 }
  0xcd   :  { %v1296_v55 = vpack.c.bf16 %v777_v47, %v777_v47  ;;  %v775_v56 = vmax.f32 %v711_v48, 0.0  ;;  %v714_v57 = vadd.f32 %v1657_v36, %v643_v49  ;;  %v641_v58 = vmul.f32 %v1652_v34, %v381_v54 }
  0xce   :  { %v1328_v60 = vpack.c.bf16 %v809_v51, %v809_v51  ;;  %v807_v61 = vmax.f32 %v743_v52, 0.0  ;;  %v746_v62 = vadd.f32 %v1657_v36, %v675_v53  ;;  %v673_v63 = vmul.f32 %v1652_v34, %v509_v59  ;;  %v1399_v0 = vpop.f32.mrf.mxu0  ;;  %v1431_v5 = vpop.f32.mrf.mxu1 }
  0xcf   :  { %1098 = vst.msk [vmem:[%s2047_s4 + $0x8] sm:$0xf] %vm1095_vm2, %v1296_v55  ;;  %v1294_v1 = vpack.c.bf16 %v775_v56, %v775_v56  ;;  %v778_v2 = vmax.f32 %v714_v57, 0.0  ;;  %v712_v3 = vadd.f32 %v1657_v36, %v641_v58  ;;  %v646_v4 = vmul.f32 %v1399_v0, %v1652_v34 }
  0xd0   :  { %1130 = vst.msk [vmem:[%s2047_s4 + $0x88] sm:$0xf] %vm1095_vm2, %v1328_v60  ;;  %v1326_v6 = vpack.c.bf16 %v807_v61, %v807_v61  ;;  %v810_v7 = vmax.f32 %v746_v62, 0.0  ;;  %v744_v8 = vadd.f32 %v1657_v36, %v673_v63  ;;  %v678_v9 = vmul.f32 %v1431_v5, %v1652_v34  ;;  %v394_v10 = vpop.f32.mrf.mxu0  ;;  %v522_v15 = vpop.f32.mrf.mxu1 }
  0xd1   :  { %1096 = vst.msk [vmem:[%s2047_s4] sm:$0xf] %vm1095_vm2, %v1294_v1  ;;  %v1297_v11 = vpack.c.bf16 %v778_v2, %v778_v2  ;;  %v776_v12 = vmax.f32 %v712_v3, 0.0  ;;  %v717_v13 = vadd.f32 %v1657_v36, %v646_v4  ;;  %v644_v14 = vmul.f32 %v1652_v34, %v394_v10 }
  0xd2   :  { %1128 = vst.msk [vmem:[%s2047_s4 + $0x80] sm:$0xf] %vm1095_vm2, %v1326_v6  ;;  %v1329_v16 = vpack.c.bf16 %v810_v7, %v810_v7  ;;  %v808_v17 = vmax.f32 %v744_v8, 0.0  ;;  %v749_v18 = vadd.f32 %v1657_v36, %v678_v9  ;;  %v676_v19 = vmul.f32 %v1652_v34, %v522_v15  ;;  %v1400_v20 = vpop.f32.mrf.mxu0  ;;  %v1432_v25 = vpop.f32.mrf.mxu1 }
  0xd3   :  { %1099 = vst.msk [vmem:[%s2047_s4 + $0xc] sm:$0xf] %vm1095_vm2, %v1297_v11  ;;  %v1295_v21 = vpack.c.bf16 %v776_v12, %v776_v12  ;;  %v781_v22 = vmax.f32 %v717_v13, 0.0  ;;  %v715_v23 = vadd.f32 %v1657_v36, %v644_v14  ;;  %v647_v24 = vmul.f32 %v1400_v20, %v1652_v34 }
  0xd4   :  { %1131 = vst.msk [vmem:[%s2047_s4 + $0x8c] sm:$0xf] %vm1095_vm2, %v1329_v16  ;;  %v1327_v26 = vpack.c.bf16 %v808_v17, %v808_v17  ;;  %v813_v27 = vmax.f32 %v749_v18, 0.0  ;;  %v747_v28 = vadd.f32 %v1657_v36, %v676_v19  ;;  %v679_v29 = vmul.f32 %v1432_v25, %v1652_v34  ;;  %v397_v30 = vpop.f32.mrf.mxu0  ;;  %v525_v37 = vpop.f32.mrf.mxu1 }
  0xd5   :  { %1097 = vst.msk [vmem:[%s2047_s4 + $0x4] sm:$0xf] %vm1095_vm2, %v1295_v21  ;;  %v1300_v31 = vpack.c.bf16 %v781_v22, %v781_v22  ;;  %v779_v32 = vmax.f32 %v715_v23, 0.0  ;;  %v718_v33 = vadd.f32 %v1657_v36, %v647_v24  ;;  %v645_v35 = vmul.f32 %v1652_v34, %v397_v30 }
  0xd6   :  { %1129 = vst.msk [vmem:[%s2047_s4 + $0x84] sm:$0xf] %vm1095_vm2, %v1327_v26  ;;  %v1332_v38 = vpack.c.bf16 %v813_v27, %v813_v27  ;;  %v811_v39 = vmax.f32 %v747_v28, 0.0  ;;  %v750_v40 = vadd.f32 %v1657_v36, %v679_v29  ;;  %v677_v41 = vmul.f32 %v1652_v34, %v525_v37  ;;  %v1403_v42 = vpop.f32.mrf.mxu0  ;;  %v1435_v47 = vpop.f32.mrf.mxu1 }
  0xd7   :  { %1102 = vst.msk [vmem:[%s2047_s4 + $0x18] sm:$0xf] %vm1095_vm2, %v1300_v31  ;;  %v1298_v43 = vpack.c.bf16 %v779_v32, %v779_v32  ;;  %v782_v44 = vmax.f32 %v718_v33, 0.0  ;;  %v716_v45 = vadd.f32 %v1657_v36, %v645_v35  ;;  %v650_v46 = vmul.f32 %v1403_v42, %v1652_v34 }
  0xd8   :  { %1134 = vst.msk [vmem:[%s2047_s4 + $0x98] sm:$0xf] %vm1095_vm2, %v1332_v38  ;;  %v1330_v48 = vpack.c.bf16 %v811_v39, %v811_v39  ;;  %v814_v49 = vmax.f32 %v750_v40, 0.0  ;;  %v748_v50 = vadd.f32 %v1657_v36, %v677_v41  ;;  %v682_v51 = vmul.f32 %v1435_v47, %v1652_v34  ;;  %v410_v52 = vpop.f32.mrf.mxu0  ;;  %v538_v57 = vpop.f32.mrf.mxu1 }
  0xd9   :  { %1100 = vst.msk [vmem:[%s2047_s4 + $0x10] sm:$0xf] %vm1095_vm2, %v1298_v43  ;;  %v1301_v53 = vpack.c.bf16 %v782_v44, %v782_v44  ;;  %v780_v54 = vmax.f32 %v716_v45, 0.0  ;;  %v721_v55 = vadd.f32 %v1657_v36, %v650_v46  ;;  %v648_v56 = vmul.f32 %v1652_v34, %v410_v52 }
  0xda   :  { %1132 = vst.msk [vmem:[%s2047_s4 + $0x90] sm:$0xf] %vm1095_vm2, %v1330_v48  ;;  %v1333_v58 = vpack.c.bf16 %v814_v49, %v814_v49  ;;  %v812_v59 = vmax.f32 %v748_v50, 0.0  ;;  %v753_v60 = vadd.f32 %v1657_v36, %v682_v51  ;;  %v680_v61 = vmul.f32 %v1652_v34, %v538_v57  ;;  %v1404_v62 = vpop.f32.mrf.mxu0  ;;  %v1436_v3 = vpop.f32.mrf.mxu1 }
  0xdb   :  { %1103 = vst.msk [vmem:[%s2047_s4 + $0x1c] sm:$0xf] %vm1095_vm2, %v1301_v53  ;;  %v1299_v63 = vpack.c.bf16 %v780_v54, %v780_v54  ;;  %v785_v0 = vmax.f32 %v721_v55, 0.0  ;;  %v719_v1 = vadd.f32 %v1657_v36, %v648_v56  ;;  %v651_v2 = vmul.f32 %v1404_v62, %v1652_v34 }
  0xdc   :  { %1135 = vst.msk [vmem:[%s2047_s4 + $0x9c] sm:$0xf] %vm1095_vm2, %v1333_v58  ;;  %v1331_v4 = vpack.c.bf16 %v812_v59, %v812_v59  ;;  %v817_v5 = vmax.f32 %v753_v60, 0.0  ;;  %v751_v6 = vadd.f32 %v1657_v36, %v680_v61  ;;  %v683_v7 = vmul.f32 %v1436_v3, %v1652_v34  ;;  %v413_v8 = vpop.f32.mrf.mxu0  ;;  %v541_v13 = vpop.f32.mrf.mxu1 }
  0xdd   :  { %1101 = vst.msk [vmem:[%s2047_s4 + $0x14] sm:$0xf] %vm1095_vm2, %v1299_v63  ;;  %v1304_v9 = vpack.c.bf16 %v785_v0, %v785_v0  ;;  %v783_v10 = vmax.f32 %v719_v1, 0.0  ;;  %v722_v11 = vadd.f32 %v1657_v36, %v651_v2  ;;  %v649_v12 = vmul.f32 %v1652_v34, %v413_v8 }
  0xde   :  { %1133 = vst.msk [vmem:[%s2047_s4 + $0x94] sm:$0xf] %vm1095_vm2, %v1331_v4  ;;  %v1336_v14 = vpack.c.bf16 %v817_v5, %v817_v5  ;;  %v815_v15 = vmax.f32 %v751_v6, 0.0  ;;  %v754_v16 = vadd.f32 %v1657_v36, %v683_v7  ;;  %v681_v17 = vmul.f32 %v1652_v34, %v541_v13  ;;  %v1407_v18 = vpop.f32.mrf.mxu0  ;;  %v1439_v23 = vpop.f32.mrf.mxu1 }
  0xdf   :  { %1106 = vst.msk [vmem:[%s2047_s4 + $0x28] sm:$0xf] %vm1095_vm2, %v1304_v9  ;;  %v1302_v19 = vpack.c.bf16 %v783_v10, %v783_v10  ;;  %v786_v20 = vmax.f32 %v722_v11, 0.0  ;;  %v720_v21 = vadd.f32 %v1657_v36, %v649_v12  ;;  %v654_v22 = vmul.f32 %v1407_v18, %v1652_v34 }
  0xe0   :  { %1138 = vst.msk [vmem:[%s2047_s4 + $0xa8] sm:$0xf] %vm1095_vm2, %v1336_v14  ;;  %v1334_v24 = vpack.c.bf16 %v815_v15, %v815_v15  ;;  %v818_v25 = vmax.f32 %v754_v16, 0.0  ;;  %v752_v26 = vadd.f32 %v1657_v36, %v681_v17  ;;  %v686_v27 = vmul.f32 %v1439_v23, %v1652_v34  ;;  %v426_v28 = vpop.f32.mrf.mxu0  ;;  %v554_v33 = vpop.f32.mrf.mxu1 }
  0xe1   :  { %1104 = vst.msk [vmem:[%s2047_s4 + $0x20] sm:$0xf] %vm1095_vm2, %v1302_v19  ;;  %v1305_v29 = vpack.c.bf16 %v786_v20, %v786_v20  ;;  %v784_v30 = vmax.f32 %v720_v21, 0.0  ;;  %v725_v31 = vadd.f32 %v1657_v36, %v654_v22  ;;  %v652_v32 = vmul.f32 %v1652_v34, %v426_v28 }
  0xe2   :  { %1136 = vst.msk [vmem:[%s2047_s4 + $0xa0] sm:$0xf] %vm1095_vm2, %v1334_v24  ;;  %v1337_v35 = vpack.c.bf16 %v818_v25, %v818_v25  ;;  %v816_v37 = vmax.f32 %v752_v26, 0.0  ;;  %v757_v38 = vadd.f32 %v1657_v36, %v686_v27  ;;  %v684_v39 = vmul.f32 %v1652_v34, %v554_v33  ;;  %v1408_v40 = vpop.f32.mrf.mxu0  ;;  %v1440_v45 = vpop.f32.mrf.mxu1 }
  0xe3   :  { %1107 = vst.msk [vmem:[%s2047_s4 + $0x2c] sm:$0xf] %vm1095_vm2, %v1305_v29  ;;  %v1303_v41 = vpack.c.bf16 %v784_v30, %v784_v30  ;;  %v789_v42 = vmax.f32 %v725_v31, 0.0  ;;  %v723_v43 = vadd.f32 %v1657_v36, %v652_v32  ;;  %v655_v44 = vmul.f32 %v1408_v40, %v1652_v34 }
  0xe4   :  { %1139 = vst.msk [vmem:[%s2047_s4 + $0xac] sm:$0xf] %vm1095_vm2, %v1337_v35  ;;  %v1335_v46 = vpack.c.bf16 %v816_v37, %v816_v37  ;;  %v821_v47 = vmax.f32 %v757_v38, 0.0  ;;  %v755_v48 = vadd.f32 %v1657_v36, %v684_v39  ;;  %v687_v49 = vmul.f32 %v1440_v45, %v1652_v34  ;;  %v429_v50 = vpop.f32.mrf.mxu0  ;;  %v557_v55 = vpop.f32.mrf.mxu1 }
  0xe5   :  { %1105 = vst.msk [vmem:[%s2047_s4 + $0x24] sm:$0xf] %vm1095_vm2, %v1303_v41  ;;  %v1308_v51 = vpack.c.bf16 %v789_v42, %v789_v42  ;;  %v787_v52 = vmax.f32 %v723_v43, 0.0  ;;  %v726_v53 = vadd.f32 %v1657_v36, %v655_v44  ;;  %v653_v54 = vmul.f32 %v1652_v34, %v429_v50 }
  0xe6   :  { %1137 = vst.msk [vmem:[%s2047_s4 + $0xa4] sm:$0xf] %vm1095_vm2, %v1335_v46  ;;  %v1340_v56 = vpack.c.bf16 %v821_v47, %v821_v47  ;;  %v819_v57 = vmax.f32 %v755_v48, 0.0  ;;  %v758_v58 = vadd.f32 %v1657_v36, %v687_v49  ;;  %v685_v59 = vmul.f32 %v1652_v34, %v557_v55  ;;  %v1411_v60 = vpop.f32.mrf.mxu0  ;;  %v1443_v1 = vpop.f32.mrf.mxu1 }
  0xe7   :  { %1110 = vst.msk [vmem:[%s2047_s4 + $0x38] sm:$0xf] %vm1095_vm2, %v1308_v51  ;;  %v1306_v61 = vpack.c.bf16 %v787_v52, %v787_v52  ;;  %v790_v62 = vmax.f32 %v726_v53, 0.0  ;;  %v724_v63 = vadd.f32 %v1657_v36, %v653_v54  ;;  %v658_v0 = vmul.f32 %v1411_v60, %v1652_v34 }
  0xe8   :  { %1142 = vst.msk [vmem:[%s2047_s4 + $0xb8] sm:$0xf] %vm1095_vm2, %v1340_v56  ;;  %v1338_v2 = vpack.c.bf16 %v819_v57, %v819_v57  ;;  %v822_v3 = vmax.f32 %v758_v58, 0.0  ;;  %v756_v4 = vadd.f32 %v1657_v36, %v685_v59  ;;  %v690_v5 = vmul.f32 %v1443_v1, %v1652_v34  ;;  %v442_v6 = vpop.f32.mrf.mxu0  ;;  %v570_v11 = vpop.f32.mrf.mxu1 }
  0xe9   :  { %1108 = vst.msk [vmem:[%s2047_s4 + $0x30] sm:$0xf] %vm1095_vm2, %v1306_v61  ;;  %v1309_v7 = vpack.c.bf16 %v790_v62, %v790_v62  ;;  %v788_v8 = vmax.f32 %v724_v63, 0.0  ;;  %v729_v9 = vadd.f32 %v1657_v36, %v658_v0  ;;  %v656_v10 = vmul.f32 %v1652_v34, %v442_v6 }
  0xea   :  { %1140 = vst.msk [vmem:[%s2047_s4 + $0xb0] sm:$0xf] %vm1095_vm2, %v1338_v2  ;;  %v1341_v12 = vpack.c.bf16 %v822_v3, %v822_v3  ;;  %v820_v13 = vmax.f32 %v756_v4, 0.0  ;;  %v761_v14 = vadd.f32 %v1657_v36, %v690_v5  ;;  %v688_v15 = vmul.f32 %v1652_v34, %v570_v11  ;;  %v1412_v16 = vpop.f32.mrf.mxu0  ;;  %v1444_v21 = vpop.f32.mrf.mxu1 }
  0xeb   :  { %1111 = vst.msk [vmem:[%s2047_s4 + $0x3c] sm:$0xf] %vm1095_vm2, %v1309_v7  ;;  %v1307_v17 = vpack.c.bf16 %v788_v8, %v788_v8  ;;  %v793_v18 = vmax.f32 %v729_v9, 0.0  ;;  %v727_v19 = vadd.f32 %v1657_v36, %v656_v10  ;;  %v659_v20 = vmul.f32 %v1412_v16, %v1652_v34 }
  0xec   :  { %1143 = vst.msk [vmem:[%s2047_s4 + $0xbc] sm:$0xf] %vm1095_vm2, %v1341_v12  ;;  %v1339_v22 = vpack.c.bf16 %v820_v13, %v820_v13  ;;  %v825_v23 = vmax.f32 %v761_v14, 0.0  ;;  %v759_v24 = vadd.f32 %v1657_v36, %v688_v15  ;;  %v691_v25 = vmul.f32 %v1444_v21, %v1652_v34  ;;  %v445_v26 = vpop.f32.mrf.mxu0  ;;  %v573_v31 = vpop.f32.mrf.mxu1 }
  0xed   :  { %1109 = vst.msk [vmem:[%s2047_s4 + $0x34] sm:$0xf] %vm1095_vm2, %v1307_v17  ;;  %v1312_v27 = vpack.c.bf16 %v793_v18, %v793_v18  ;;  %v791_v28 = vmax.f32 %v727_v19, 0.0  ;;  %v730_v29 = vadd.f32 %v1657_v36, %v659_v20  ;;  %v657_v30 = vmul.f32 %v1652_v34, %v445_v26 }
  0xee   :  { %1141 = vst.msk [vmem:[%s2047_s4 + $0xb4] sm:$0xf] %vm1095_vm2, %v1339_v22  ;;  %v1344_v32 = vpack.c.bf16 %v825_v23, %v825_v23  ;;  %v823_v33 = vmax.f32 %v759_v24, 0.0  ;;  %v762_v35 = vadd.f32 %v1657_v36, %v691_v25  ;;  %v689_v37 = vmul.f32 %v1652_v34, %v573_v31  ;;  %v1415_v38 = vpop.f32.mrf.mxu0  ;;  %v1447_v43 = vpop.f32.mrf.mxu1 }
  0xef   :  { %1114 = vst.msk [vmem:[%s2047_s4 + $0x48] sm:$0xf] %vm1095_vm2, %v1312_v27  ;;  %v1310_v39 = vpack.c.bf16 %v791_v28, %v791_v28  ;;  %v794_v40 = vmax.f32 %v730_v29, 0.0  ;;  %v728_v41 = vadd.f32 %v1657_v36, %v657_v30  ;;  %v662_v42 = vmul.f32 %v1415_v38, %v1652_v34 }
  0xf0   :  { %1146 = vst.msk [vmem:[%s2047_s4 + $0xc8] sm:$0xf] %vm1095_vm2, %v1344_v32  ;;  %v1342_v44 = vpack.c.bf16 %v823_v33, %v823_v33  ;;  %v826_v45 = vmax.f32 %v762_v35, 0.0  ;;  %v760_v46 = vadd.f32 %v1657_v36, %v689_v37  ;;  %v694_v47 = vmul.f32 %v1447_v43, %v1652_v34  ;;  %v458_v48 = vpop.f32.mrf.mxu0  ;;  %v586_v53 = vpop.f32.mrf.mxu1 }
  0xf1   :  { %1112 = vst.msk [vmem:[%s2047_s4 + $0x40] sm:$0xf] %vm1095_vm2, %v1310_v39  ;;  %v1313_v49 = vpack.c.bf16 %v794_v40, %v794_v40  ;;  %v792_v50 = vmax.f32 %v728_v41, 0.0  ;;  %v733_v51 = vadd.f32 %v1657_v36, %v662_v42  ;;  %v660_v52 = vmul.f32 %v1652_v34, %v458_v48 }
  0xf2   :  { %1144 = vst.msk [vmem:[%s2047_s4 + $0xc0] sm:$0xf] %vm1095_vm2, %v1342_v44  ;;  %v1345_v54 = vpack.c.bf16 %v826_v45, %v826_v45  ;;  %v824_v55 = vmax.f32 %v760_v46, 0.0  ;;  %v765_v56 = vadd.f32 %v1657_v36, %v694_v47  ;;  %v692_v57 = vmul.f32 %v1652_v34, %v586_v53  ;;  %v1416_v58 = vpop.f32.mrf.mxu0  ;;  %v1448_v63 = vpop.f32.mrf.mxu1 }
  0xf3   :  { %1115 = vst.msk [vmem:[%s2047_s4 + $0x4c] sm:$0xf] %vm1095_vm2, %v1313_v49  ;;  %v1311_v59 = vpack.c.bf16 %v792_v50, %v792_v50  ;;  %v797_v60 = vmax.f32 %v733_v51, 0.0  ;;  %v731_v61 = vadd.f32 %v1657_v36, %v660_v52  ;;  %v663_v62 = vmul.f32 %v1416_v58, %v1652_v34 }
  0xf4   :  { %1147 = vst.msk [vmem:[%s2047_s4 + $0xcc] sm:$0xf] %vm1095_vm2, %v1345_v54  ;;  %v1343_v0 = vpack.c.bf16 %v824_v55, %v824_v55  ;;  %v829_v1 = vmax.f32 %v765_v56, 0.0  ;;  %v763_v2 = vadd.f32 %v1657_v36, %v692_v57  ;;  %v695_v3 = vmul.f32 %v1448_v63, %v1652_v34  ;;  %v461_v4 = vpop.f32.mrf.mxu0  ;;  %v589_v9 = vpop.f32.mrf.mxu1 }
  0xf5   :  { %1113 = vst.msk [vmem:[%s2047_s4 + $0x44] sm:$0xf] %vm1095_vm2, %v1311_v59  ;;  %v1316_v5 = vpack.c.bf16 %v797_v60, %v797_v60  ;;  %v795_v6 = vmax.f32 %v731_v61, 0.0  ;;  %v734_v7 = vadd.f32 %v1657_v36, %v663_v62  ;;  %v661_v8 = vmul.f32 %v1652_v34, %v461_v4 }
  0xf6   :  { %1145 = vst.msk [vmem:[%s2047_s4 + $0xc4] sm:$0xf] %vm1095_vm2, %v1343_v0  ;;  %v1348_v10 = vpack.c.bf16 %v829_v1, %v829_v1  ;;  %v827_v11 = vmax.f32 %v763_v2, 0.0  ;;  %v766_v12 = vadd.f32 %v1657_v36, %v695_v3  ;;  %v693_v13 = vmul.f32 %v1652_v34, %v589_v9  ;;  %v1419_v14 = vpop.f32.mrf.mxu0  ;;  %v1451_v19 = vpop.f32.mrf.mxu1 }
  0xf7   :  { %1118 = vst.msk [vmem:[%s2047_s4 + $0x58] sm:$0xf] %vm1095_vm2, %v1316_v5  ;;  %v1314_v15 = vpack.c.bf16 %v795_v6, %v795_v6  ;;  %v798_v16 = vmax.f32 %v734_v7, 0.0  ;;  %v732_v17 = vadd.f32 %v1657_v36, %v661_v8  ;;  %v666_v18 = vmul.f32 %v1419_v14, %v1652_v34 }
  0xf8   :  { %1150 = vst.msk [vmem:[%s2047_s4 + $0xd8] sm:$0xf] %vm1095_vm2, %v1348_v10  ;;  %v1346_v20 = vpack.c.bf16 %v827_v11, %v827_v11  ;;  %v830_v21 = vmax.f32 %v766_v12, 0.0  ;;  %v764_v22 = vadd.f32 %v1657_v36, %v693_v13  ;;  %v698_v23 = vmul.f32 %v1451_v19, %v1652_v34  ;;  %v474_v24 = vpop.f32.mrf.mxu0  ;;  %v602_v29 = vpop.f32.mrf.mxu1 }
  0xf9   :  { %1116 = vst.msk [vmem:[%s2047_s4 + $0x50] sm:$0xf] %vm1095_vm2, %v1314_v15  ;;  %v1317_v25 = vpack.c.bf16 %v798_v16, %v798_v16  ;;  %v796_v26 = vmax.f32 %v732_v17, 0.0  ;;  %v737_v27 = vadd.f32 %v1657_v36, %v666_v18  ;;  %v664_v28 = vmul.f32 %v1652_v34, %v474_v24 }
  0xfa   :  { %1148 = vst.msk [vmem:[%s2047_s4 + $0xd0] sm:$0xf] %vm1095_vm2, %v1346_v20  ;;  %v1349_v30 = vpack.c.bf16 %v830_v21, %v830_v21  ;;  %v828_v31 = vmax.f32 %v764_v22, 0.0  ;;  %v769_v32 = vadd.f32 %v1657_v36, %v698_v23  ;;  %v696_v33 = vmul.f32 %v1652_v34, %v602_v29  ;;  %v1420_v35 = vpop.f32.mrf.mxu0  ;;  %v1452_v41 = vpop.f32.mrf.mxu1 }
  0xfb   :  { %1119 = vst.msk [vmem:[%s2047_s4 + $0x5c] sm:$0xf] %vm1095_vm2, %v1317_v25  ;;  %v1315_v37 = vpack.c.bf16 %v796_v26, %v796_v26  ;;  %v801_v38 = vmax.f32 %v737_v27, 0.0  ;;  %v735_v39 = vadd.f32 %v1657_v36, %v664_v28  ;;  %v667_v40 = vmul.f32 %v1420_v35, %v1652_v34 }
  0xfc   :  { %1151 = vst.msk [vmem:[%s2047_s4 + $0xdc] sm:$0xf] %vm1095_vm2, %v1349_v30  ;;  %v1347_v42 = vpack.c.bf16 %v828_v31, %v828_v31  ;;  %v833_v43 = vmax.f32 %v769_v32, 0.0  ;;  %v767_v44 = vadd.f32 %v1657_v36, %v696_v33  ;;  %v699_v45 = vmul.f32 %v1452_v41, %v1652_v34  ;;  %v477_v46 = vpop.f32.mrf.mxu0  ;;  %v605_v51 = vpop.f32.mrf.mxu1 }
  0xfd   :  { %1117 = vst.msk [vmem:[%s2047_s4 + $0x54] sm:$0xf] %vm1095_vm2, %v1315_v37  ;;  %v1320_v47 = vpack.c.bf16 %v801_v38, %v801_v38  ;;  %v799_v48 = vmax.f32 %v735_v39, 0.0  ;;  %v738_v49 = vadd.f32 %v1657_v36, %v667_v40  ;;  %v665_v50 = vmul.f32 %v1652_v34, %v477_v46 }
  0xfe   :  { %1149 = vst.msk [vmem:[%s2047_s4 + $0xd4] sm:$0xf] %vm1095_vm2, %v1347_v42  ;;  %v1352_v52 = vpack.c.bf16 %v833_v43, %v833_v43  ;;  %v831_v53 = vmax.f32 %v767_v44, 0.0  ;;  %v770_v54 = vadd.f32 %v1657_v36, %v699_v45  ;;  %v697_v55 = vmul.f32 %v1652_v34, %v605_v51  ;;  %v1423_v56 = vpop.f32.mrf.mxu0  ;;  %v1455_v61 = vpop.f32.mrf.mxu1 }
  0xff   :  { %1122 = vst.msk [vmem:[%s2047_s4 + $0x68] sm:$0xf] %vm1095_vm2, %v1320_v47  ;;  %v1318_v57 = vpack.c.bf16 %v799_v48, %v799_v48  ;;  %v802_v58 = vmax.f32 %v738_v49, 0.0  ;;  %v736_v59 = vadd.f32 %v1657_v36, %v665_v50  ;;  %v670_v60 = vmul.f32 %v1423_v56, %v1652_v34 }
 0x100   :  { %1154 = vst.msk [vmem:[%s2047_s4 + $0xe8] sm:$0xf] %vm1095_vm2, %v1352_v52  ;;  %v1350_v62 = vpack.c.bf16 %v831_v53, %v831_v53  ;;  %v834_v63 = vmax.f32 %v770_v54, 0.0  ;;  %v768_v0 = vadd.f32 %v1657_v36, %v697_v55  ;;  %v702_v1 = vmul.f32 %v1455_v61, %v1652_v34  ;;  %v490_v2 = vpop.f32.mrf.mxu0  ;;  %v618_v7 = vpop.f32.mrf.mxu1 }
 0x101   :  { %1120 = vst.msk [vmem:[%s2047_s4 + $0x60] sm:$0xf] %vm1095_vm2, %v1318_v57  ;;  %v1321_v3 = vpack.c.bf16 %v802_v58, %v802_v58  ;;  %v800_v4 = vmax.f32 %v736_v59, 0.0  ;;  %v741_v5 = vadd.f32 %v1657_v36, %v670_v60  ;;  %v668_v6 = vmul.f32 %v1652_v34, %v490_v2 }
 0x102   :  { %1152 = vst.msk [vmem:[%s2047_s4 + $0xe0] sm:$0xf] %vm1095_vm2, %v1350_v62  ;;  %v1353_v8 = vpack.c.bf16 %v834_v63, %v834_v63  ;;  %v832_v9 = vmax.f32 %v768_v0, 0.0  ;;  %v773_v10 = vadd.f32 %v1657_v36, %v702_v1  ;;  %v700_v11 = vmul.f32 %v1652_v34, %v618_v7  ;;  %v1424_v12 = vpop.f32.mrf.mxu0  ;;  %v1456_v17 = vpop.f32.mrf.mxu1 }
 0x103   :  { %1123 = vst.msk [vmem:[%s2047_s4 + $0x6c] sm:$0xf] %vm1095_vm2, %v1321_v3  ;;  %v1319_v13 = vpack.c.bf16 %v800_v4, %v800_v4  ;;  %v805_v14 = vmax.f32 %v741_v5, 0.0  ;;  %v739_v15 = vadd.f32 %v1657_v36, %v668_v6  ;;  %v671_v16 = vmul.f32 %v1424_v12, %v1652_v34 }
 0x104   :  { %1155 = vst.msk [vmem:[%s2047_s4 + $0xec] sm:$0xf] %vm1095_vm2, %v1353_v8  ;;  %v1351_v18 = vpack.c.bf16 %v832_v9, %v832_v9  ;;  %v837_v19 = vmax.f32 %v773_v10, 0.0  ;;  %v771_v20 = vadd.f32 %v1657_v36, %v700_v11  ;;  %v703_v21 = vmul.f32 %v1456_v17, %v1652_v34  ;;  %v493_v22 = vpop.f32.mrf.mxu0  ;;  %v621_v27 = vpop.f32.mrf.mxu1 }
 0x105   :  { %1121 = vst.msk [vmem:[%s2047_s4 + $0x64] sm:$0xf] %vm1095_vm2, %v1319_v13  ;;  %v1324_v23 = vpack.c.bf16 %v805_v14, %v805_v14  ;;  %v803_v24 = vmax.f32 %v739_v15, 0.0  ;;  %v742_v25 = vadd.f32 %v1657_v36, %v671_v16  ;;  %v669_v26 = vmul.f32 %v1652_v34, %v493_v22 }
 0x106   :  { %1153 = vst.msk [vmem:[%s2047_s4 + $0xe4] sm:$0xf] %vm1095_vm2, %v1351_v18  ;;  %v1356_v28 = vpack.c.bf16 %v837_v19, %v837_v19  ;;  %v835_v29 = vmax.f32 %v771_v20, 0.0  ;;  %v774_v30 = vadd.f32 %v1657_v36, %v703_v21  ;;  %v701_v31 = vmul.f32 %v1652_v34, %v621_v27 }
 0x107   :  { %1126 = vst.msk [vmem:[%s2047_s4 + $0x78] sm:$0xf] %vm1095_vm2, %v1324_v23  ;;  %v1322_v32 = vpack.c.bf16 %v803_v24, %v803_v24  ;;  %v806_v33 = vmax.f32 %v742_v25, 0.0  ;;  %v740_v35 = vadd.f32 %v1657_v36, %v669_v26 }
 0x108   :  { %1158 = vst.msk [vmem:[%s2047_s4 + $0xf8] sm:$0xf] %vm1095_vm2, %v1356_v28  ;;  %v1354_v37 = vpack.c.bf16 %v835_v29, %v835_v29  ;;  %v838_v38 = vmax.f32 %v774_v30, 0.0  ;;  %v772_v39 = vadd.f32 %v1657_v36, %v701_v31 }
 0x109   :  { %1124 = vst.msk [vmem:[%s2047_s4 + $0x70] sm:$0xf] %vm1095_vm2, %v1322_v32  ;;  %v1325_v34 = vpack.c.bf16 %v806_v33, %v806_v33  ;;  %v804_v40 = vmax.f32 %v740_v35, 0.0 }
 0x10a   :  { %1156 = vst.msk [vmem:[%s2047_s4 + $0xf0] sm:$0xf] %vm1095_vm2, %v1354_v37  ;;  %v1357_v41 = vpack.c.bf16 %v838_v38, %v838_v38  ;;  %v836_v42 = vmax.f32 %v772_v39, 0.0 }
 0x10b   :  { %1127 = vst.msk [vmem:[%s2047_s4 + $0x7c] sm:$0xf] %vm1095_vm2, %v1325_v34  ;;  %v1323_v36 = vpack.c.bf16 %v804_v40, %v804_v40 }
 0x10c   :  { %1159 = vst.msk [vmem:[%s2047_s4 + $0xfc] sm:$0xf] %vm1095_vm2, %v1357_v41  ;;  %v1355_v43 = vpack.c.bf16 %v836_v42, %v836_v42 }
 0x10d   :  { %1125 = vst.msk [vmem:[%s2047_s4 + $0x74] sm:$0xf] %vm1095_vm2, %v1323_v36 }
 0x10e   :  { %1157 = vst.msk [vmem:[%s2047_s4 + $0xf4] sm:$0xf] %vm1095_vm2, %v1355_v43 }

</bundles_post_ra>
